<compile_context>
chip_gen: v6e
topology: v6e:2x2x1
jax: 0.10.0
libtpu: 0.0.40
codegen_flags: <defaults>
</compile_context>

<pallas_src>
import functools
from math import sqrt

import jax
import jax.numpy as jnp
from jax import lax
from jax.experimental import pallas as pl
from jax.experimental.pallas import tpu as pltpu

_SQRT2 = sqrt(2.0)
_SENTINEL = 1e30            # padded rows: erf((x - SENTINEL) * inv) == -1 exactly


# ----------------------------- in-kernel math -----------------------------
def _erf(x):
    # Abramowitz & Stegun 7.1.26 polynomial (|abs err| <= 1.5e-7 exact,
    # ~1e-4 with approximate reciprocal); built only from abs/exp/mul/add/
    # where so it lowers cleanly in Mosaic.  Called on pre-scaled arguments.
    a1, a2, a3, a4, a5 = (0.254829592, -0.284496736, 1.421413741,
                          -1.453152027, 1.061405429)
    p = 0.3275911
    ax = jnp.abs(x)
    t = pl.reciprocal(1.0 + p * ax, approx=True)    # EUP vrcp, off the VALU path
    poly = ((((a5 * t + a4) * t + a3) * t + a2) * t + a1) * t
    y = 1.0 - poly * jnp.exp(-ax * ax)
    return jnp.where(x < 0.0, -y, y)


def _erfinv(x):
    # Giles (2010) single-precision inverse-erf approximation (log/sqrt/where).
    w = -jnp.log((1.0 - x) * (1.0 + x))
    wc = w - 2.5
    pc = 2.81022636e-08
    for c in (3.43273939e-07, -3.5233877e-06, -4.39150654e-06, 2.1858087e-04,
              -1.25372503e-03, -4.17768164e-03, 2.46640727e-01, 1.50140941e+00):
        pc = c + pc * wc
    wt = jnp.sqrt(w) - 3.0
    pt = -2.00214257e-04
    for c in (1.00950558e-04, 1.34934322e-03, -3.67342844e-03, 5.73950773e-03,
              -7.62246130e-03, 9.43887047e-03, 1.00167406e+00, 2.83297682e+00):
        pt = c + pt * wt
    return jnp.where(w < 5.0, pc, pt) * x


def _standard_normal_ppf(u):
    lo = 9e-08
    u = jnp.clip(u, lo, 1.0 - lo)
    return _SQRT2 * _erfinv(2.0 * u - 1.0)


# ------------------------------- Pallas kernel ------------------------------
def _batch_pit_kernel(x_ref, d_ref, inv_ref, o_ref, acc_ref, *,
                      inv_size, pad_rows, normal_backtransform):
    si = pl.program_id(1)

    @pl.when(si == 0)
    def _():
        acc_ref[...] = jnp.zeros_like(acc_ref)

    inv = inv_ref[...]                                  # (1, f_tile) f32
    x_s = x_ref[...].astype(jnp.float32) * inv          # (B, f_tile), scaled once

    B, f_tile = x_s.shape
    n_chunks = d_ref.shape[0]                           # s_tile // 8 sublane chunks

    def chunk_body(c, acc):
        d_s = d_ref[c] * inv                            # (8, f_tile), scaled chunk
        # 8 statically-unrolled rows: pure (B, f_tile) VALU/EUP work, no 3-D
        # temporary and no cross-sublane reduction; accumulator stays in vregs.
        for r in range(8):
            acc = acc + _erf(x_s - d_s[r:r + 1, :])
        return acc

    partial = lax.fori_loop(0, n_chunks, chunk_body,
                            jnp.zeros((B, f_tile), jnp.float32))
    acc_ref[...] += partial

    @pl.when(si == pl.num_programs(1) - 1)
    def _():
        # sum_s Phi(z) = 0.5*size + 0.5*sum_s erf(z_scaled); each padded sentinel
        # row contributes erf == -1 exactly, corrected by +pad_rows.
        u = (acc_ref[...] + pad_rows) * (0.5 * inv_size) + 0.5
        if normal_backtransform:
            res = _standard_normal_ppf(u)
        else:
            res = u - 0.5
        o_ref[...] = res.astype(o_ref.dtype)


# --------------------------------- wrapper ----------------------------------
def _round_up(n: int, m: int) -> int:
    return ((n + m - 1) // m) * m


def batch_pit_norm1d_forward(x, cdf_values, bw_param=None, *,
                             trainable_bandwidths=False,
                             normal_backtransform=True,
                             f_tile=128, s_tile=1024):
    """BatchPitNorm1d forward (eval-mode semantics).

    x:          (batch, num_features)
    cdf_values: (size, num_features)   -- the valid rows of the cdf_data buffer
    bw_param:   (1, num_features)      -- only used if trainable_bandwidths
    """
    # TODO(synk): the stateful training-mode fill() that appends batches into
    # the cdf_data buffer is host-side bookkeeping; modeled here by passing an
    # already-filled buffer.
    B, F = x.shape
    size = int(cdf_values.shape[0])
    x32 = x.astype(jnp.float32)
    data32 = cdf_values.astype(jnp.float32)   # ensure f32 (8,128) sublane tiling

    if trainable_bandwidths:
        bw = jax.nn.sigmoid(bw_param.astype(jnp.float32)).reshape(1, F)
    else:
        # Per-feature Silverman-style rule of thumb (glue: requires a sort).
        q25 = jnp.quantile(data32, 0.25, axis=0)
        q75 = jnp.quantile(data32, 0.75, axis=0)
        iqr = q75 - q25
        std = jnp.std(data32, axis=0, ddof=1)   # torch .std() is unbiased
        bw = (0.9 * jnp.minimum(std, iqr / 1.34)
              * float(size) ** (-0.2)).reshape(1, F)
    # Fold the bandwidth divide and the /sqrt(2) of the normal CDF into one
    # per-feature scale applied outside the per-element hot path.
    inv = 1.0 / (bw * _SQRT2)                                  # (1, F)

    # ---- lane-dense feature padding + row tiling ----------------------------
    f_tile = max(128, _round_up(int(f_tile), 128))
    F_pad = _round_up(F, f_tile)
    s_tile = max(8, min(_round_up(int(s_tile), 8), _round_up(size, 8)))
    size_pad = _round_up(size, s_tile)
    pad_rows = size_pad - size

    x_p = jnp.pad(x32, ((0, 0), (0, F_pad - F)))
    inv_p = jnp.pad(inv.astype(jnp.float32), ((0, 0), (0, F_pad - F)),
                    constant_values=1.0)
    data_p = jnp.pad(data32, ((0, pad_rows), (0, F_pad - F)),
                     constant_values=_SENTINEL)
    data_p = data_p.reshape(size_pad // 8, 8, F_pad)   # sublane chunks of 8 rows

    grid = (F_pad // f_tile, size_pad // s_tile)
    kernel = functools.partial(
        _batch_pit_kernel,
        inv_size=1.0 / float(size),
        pad_rows=float(pad_rows),
        normal_backtransform=normal_backtransform)

    out = pl.pallas_call(
        kernel,
        out_shape=jax.ShapeDtypeStruct((B, F_pad), x.dtype),
        grid_spec=pltpu.PrefetchScalarGridSpec(
            num_scalar_prefetch=0,
            grid=grid,
            in_specs=[
                pl.BlockSpec((B, f_tile), lambda fi, si: (0, fi)),
                pl.BlockSpec((s_tile // 8, 8, f_tile),
                             lambda fi, si: (si, 0, fi)),
                pl.BlockSpec((1, f_tile), lambda fi, si: (0, fi)),
            ],
            out_specs=pl.BlockSpec((B, f_tile), lambda fi, si: (0, fi)),
            scratch_shapes=[pltpu.VMEM((B, f_tile), jnp.float32)],
        ),
        compiler_params=pltpu.CompilerParams(
            dimension_semantics=("parallel", "arbitrary")),
    )(x_p, data_p, inv_p)
    return out[:, :F]


# ------------------------------ pure-JAX check -------------------------------
def _reference_forward(x, cdf_values, normal_backtransform=True):
    from jax.scipy import special as jsp
    size = cdf_values.shape[0]
    data32 = cdf_values.astype(jnp.float32)
    q25 = jnp.quantile(data32, 0.25, axis=0)
    q75 = jnp.quantile(data32, 0.75, axis=0)
    std = jnp.std(data32, axis=0, ddof=1)
    bw = 0.9 * jnp.minimum(std, (q75 - q25) / 1.34) * float(size) ** (-0.2)
    z = (x[:, None, :] - data32[None, :, :]) / bw[None, None, :]
    u = jnp.mean(0.5 * (1.0 + jsp.erf(z / _SQRT2)), axis=1)
    if normal_backtransform:
        lo = 9e-08
        u = jnp.clip(u, lo, 1.0 - lo)
        return _SQRT2 * jsp.erfinv(2.0 * u - 1.0)
    return u - 0.5


if __name__ == "__main__":
    key = jax.random.PRNGKey(0)
    k_buf, k_x = jax.random.split(key)

    num_features = 32
    num_pit_samples = 64   # buffer fully filled -> size == num_pit_samples
    batch = 8

    # Deterministic buffer (as if filled by earlier training batches) + input.
    cdf_data = jax.random.normal(k_buf, (num_pit_samples, num_features),
                                 dtype=jnp.float32)
    x = jax.random.normal(k_x, (batch, num_features), dtype=jnp.float32)

    out = batch_pit_norm1d_forward(x, cdf_data,
                                   trainable_bandwidths=False,
                                   normal_backtransform=True)
    out = jax.block_until_ready(out)
    assert out.shape == (batch, num_features) and out.dtype == jnp.float32

    ref = jax.block_until_ready(_reference_forward(x, cdf_data, True))
    max_err = float(jnp.max(jnp.abs(out - ref)))
    assert max_err < 5e-2, f"mismatch vs reference: max abs err = {max_err}"

    print("KERNEL_OK")
</pallas_src>

<mosaic_0001>
module attributes {stable_mosaic.version = 11 : i64} {
  func.func @_batch_pit_kernel(%arg0: i32, %arg1: i32, %arg2: memref<8x128xf32, #tpu.memory_space<vmem>>, %arg3: memref<8x8x128xf32, #tpu.memory_space<vmem>>, %arg4: memref<1x128xf32, #tpu.memory_space<vmem>>, %arg5: memref<8x128xf32, #tpu.memory_space<vmem>>, %arg6: memref<8x128xf32, #tpu.memory_space<vmem>>) attributes {dimension_semantics = [#tpu.dimension_semantics<parallel>, #tpu.dimension_semantics<arbitrary>], iteration_bounds = array<i64: 1, 1>, scalar_prefetch = 0 : i64, scratch_operands = 1 : i64, tpu.core_type = #tpu.core_type<tc>, window_params = [{transform_indices = @transform_0, window_bounds = array<i64: 8, 128>}, {transform_indices = @transform_1, window_bounds = array<i64: 8, 8, 128>}, {transform_indices = @transform_2, window_bounds = array<i64: 1, 128>}, {transform_indices = @transform_3, window_bounds = array<i64: 8, 128>}]} {
    %c0_i32 = arith.constant 0 : i32
    %0 = arith.cmpi eq, %arg1, %c0_i32 : i32
    %1 = arith.extui %0 : i1 to i32
    %c0_i32_0 = arith.constant 0 : i32
    %2 = arith.cmpi ne, %1, %c0_i32_0 : i32
    scf.if %2 {
      %cst_12 = arith.constant 0.000000e+00 : f32
      %16 = vector.broadcast %cst_12 : f32 to vector<8x128xf32>
      %c0_13 = arith.constant 0 : index
      %c0_14 = arith.constant 0 : index
      %17 = vector.load %arg6[%c0_13, %c0_14] : memref<8x128xf32, #tpu.memory_space<vmem>>, vector<8x128xf32>
      tpu.vector_store %arg6[%c0_13, %c0_14], %16 {strides = array<i32>} : memref<8x128xf32, #tpu.memory_space<vmem>>, vector<8x128xf32>,
    } else {
    }
    %c0 = arith.constant 0 : index
    %c0_1 = arith.constant 0 : index
    %3 = vector.load %arg4[%c0, %c0_1] : memref<1x128xf32, #tpu.memory_space<vmem>>, vector<1x128xf32>
    %c0_2 = arith.constant 0 : index
    %c0_3 = arith.constant 0 : index
    %4 = vector.load %arg2[%c0_2, %c0_3] : memref<8x128xf32, #tpu.memory_space<vmem>>, vector<8x128xf32>
    %5 = vector.broadcast %3 : vector<1x128xf32> to vector<8x128xf32>
    %6 = arith.mulf %4, %5 : vector<8x128xf32>
    %cst = arith.constant 0.000000e+00 : f32
    %7 = vector.broadcast %cst : f32 to vector<8x128xf32>
    %c0_i32_4 = arith.constant 0 : i32
    %c8_i32 = arith.constant 8 : i32
    %8 = arith.addi %c0_i32_4, %c8_i32 : i32
    %c1_i32 = arith.constant 1 : i32
    %9 = scf.for %arg7 = %c0_i32_4 to %8 step %c1_i32 iter_args(%arg8 = %7) -> (vector<8x128xf32>)  : i32 {
      %16 = arith.index_cast %arg7 : i32 to index
      %c0_12 = arith.constant 0 : index
      %c0_13 = arith.constant 0 : index
      %17 = vector.load %arg3[%16, %c0_12, %c0_13] : memref<8x8x128xf32, #tpu.memory_space<vmem>>, vector<1x8x128xf32>
      %18 = vector.shape_cast %17 : vector<1x8x128xf32> to vector<8x128xf32>
      %19 = vector.broadcast %3 : vector<1x128xf32> to vector<8x128xf32>
      %20 = arith.mulf %18, %19 : vector<8x128xf32>
      %21 = vector.extract_strided_slice %20 {offsets = [0, 0], sizes = [1, 128], strides = [1, 1]} : vector<8x128xf32> to vector<1x128xf32>
      %22 = vector.broadcast %21 : vector<1x128xf32> to vector<8x128xf32>
      %23 = arith.subf %6, %22 : vector<8x128xf32>
      %24 = math.absf %23 : vector<8x128xf32>
      %cst_14 = arith.constant 0.327591091 : f32
      %25 = vector.broadcast %cst_14 : f32 to vector<8x128xf32>
      %26 = arith.mulf %25, %24 : vector<8x128xf32>
      %cst_15 = arith.constant 1.000000e+00 : f32
      %27 = vector.broadcast %cst_15 : f32 to vector<8x128xf32>
      %28 = arith.addf %27, %26 : vector<8x128xf32>
      %29 = tpu.reciprocal %28 {approx = true} : vector<8x128xf32> -> vector<8x128xf32>
      %cst_16 = arith.constant 1.06140542 : f32
      %30 = vector.broadcast %cst_16 : f32 to vector<8x128xf32>
      %31 = arith.mulf %30, %29 : vector<8x128xf32>
      %cst_17 = arith.constant -1.45315206 : f32
      %32 = vector.broadcast %cst_17 : f32 to vector<8x128xf32>
      %33 = arith.addf %31, %32 : vector<8x128xf32>
      %34 = arith.mulf %33, %29 : vector<8x128xf32>
      %cst_18 = arith.constant 1.42141378 : f32
      %35 = vector.broadcast %cst_18 : f32 to vector<8x128xf32>
      %36 = arith.addf %34, %35 : vector<8x128xf32>
      %37 = arith.mulf %36, %29 : vector<8x128xf32>
      %cst_19 = arith.constant -0.284496725 : f32
      %38 = vector.broadcast %cst_19 : f32 to vector<8x128xf32>
      %39 = arith.addf %37, %38 : vector<8x128xf32>
      %40 = arith.mulf %39, %29 : vector<8x128xf32>
      %cst_20 = arith.constant 0.254829586 : f32
      %41 = vector.broadcast %cst_20 : f32 to vector<8x128xf32>
      %42 = arith.addf %40, %41 : vector<8x128xf32>
      %43 = arith.mulf %42, %29 : vector<8x128xf32>
      %cst_21 = arith.constant 0.000000e+00 : f32
      %44 = vector.broadcast %cst_21 : f32 to vector<8x128xf32>
      %45 = arith.subf %44, %24 : vector<8x128xf32>
      %46 = arith.mulf %45, %24 : vector<8x128xf32>
      %47 = math.exp %46 : vector<8x128xf32>
      %48 = arith.mulf %43, %47 : vector<8x128xf32>
      %cst_22 = arith.constant 1.000000e+00 : f32
      %49 = vector.broadcast %cst_22 : f32 to vector<8x128xf32>
      %50 = arith.subf %49, %48 : vector<8x128xf32>
      %cst_23 = arith.constant 0.000000e+00 : f32
      %51 = vector.broadcast %cst_23 : f32 to vector<8x128xf32>
      %52 = arith.cmpf olt, %23, %51 : vector<8x128xf32>
      %cst_24 = arith.constant 0.000000e+00 : f32
      %53 = vector.broadcast %cst_24 : f32 to vector<8x128xf32>
      %54 = arith.subf %53, %50 : vector<8x128xf32>
      %55 = arith.select %52, %54, %50 : vector<8x128xi1>, vector<8x128xf32>
      %56 = arith.addf %arg8, %55 : vector<8x128xf32>
      %57 = vector.extract_strided_slice %20 {offsets = [1, 0], sizes = [1, 128], strides = [1, 1]} : vector<8x128xf32> to vector<1x128xf32>
      %58 = vector.broadcast %57 : vector<1x128xf32> to vector<8x128xf32>
      %59 = arith.subf %6, %58 : vector<8x128xf32>
      %60 = math.absf %59 : vector<8x128xf32>
      %cst_25 = arith.constant 0.327591091 : f32
      %61 = vector.broadcast %cst_25 : f32 to vector<8x128xf32>
      %62 = arith.mulf %61, %60 : vector<8x128xf32>
      %cst_26 = arith.constant 1.000000e+00 : f32
      %63 = vector.broadcast %cst_26 : f32 to vector<8x128xf32>
      %64 = arith.addf %63, %62 : vector<8x128xf32>
      %65 = tpu.reciprocal %64 {approx = true} : vector<8x128xf32> -> vector<8x128xf32>
      %cst_27 = arith.constant 1.06140542 : f32
      %66 = vector.broadcast %cst_27 : f32 to vector<8x128xf32>
      %67 = arith.mulf %66, %65 : vector<8x128xf32>
      %cst_28 = arith.constant -1.45315206 : f32
      %68 = vector.broadcast %cst_28 : f32 to vector<8x128xf32>
      %69 = arith.addf %67, %68 : vector<8x128xf32>
      %70 = arith.mulf %69, %65 : vector<8x128xf32>
      %cst_29 = arith.constant 1.42141378 : f32
      %71 = vector.broadcast %cst_29 : f32 to vector<8x128xf32>
      %72 = arith.addf %70, %71 : vector<8x128xf32>
      %73 = arith.mulf %72, %65 : vector<8x128xf32>
      %cst_30 = arith.constant -0.284496725 : f32
      %74 = vector.broadcast %cst_30 : f32 to vector<8x128xf32>
      %75 = arith.addf %73, %74 : vector<8x128xf32>
      %76 = arith.mulf %75, %65 : vector<8x128xf32>
      %cst_31 = arith.constant 0.254829586 : f32
      %77 = vector.broadcast %cst_31 : f32 to vector<8x128xf32>
      %78 = arith.addf %76, %77 : vector<8x128xf32>
      %79 = arith.mulf %78, %65 : vector<8x128xf32>
      %cst_32 = arith.constant 0.000000e+00 : f32
      %80 = vector.broadcast %cst_32 : f32 to vector<8x128xf32>
      %81 = arith.subf %80, %60 : vector<8x128xf32>
      %82 = arith.mulf %81, %60 : vector<8x128xf32>
      %83 = math.exp %82 : vector<8x128xf32>
      %84 = arith.mulf %79, %83 : vector<8x128xf32>
      %cst_33 = arith.constant 1.000000e+00 : f32
      %85 = vector.broadcast %cst_33 : f32 to vector<8x128xf32>
      %86 = arith.subf %85, %84 : vector<8x128xf32>
      %cst_34 = arith.constant 0.000000e+00 : f32
      %87 = vector.broadcast %cst_34 : f32 to vector<8x128xf32>
      %88 = arith.cmpf olt, %59, %87 : vector<8x128xf32>
      %cst_35 = arith.constant 0.000000e+00 : f32
      %89 = vector.broadcast %cst_35 : f32 to vector<8x128xf32>
      %90 = arith.subf %89, %86 : vector<8x128xf32>
      %91 = arith.select %88, %90, %86 : vector<8x128xi1>, vector<8x128xf32>
      %92 = arith.addf %56, %91 : vector<8x128xf32>
      %93 = vector.extract_strided_slice %20 {offsets = [2, 0], sizes = [1, 128], strides = [1, 1]} : vector<8x128xf32> to vector<1x128xf32>
      %94 = vector.broadcast %93 : vector<1x128xf32> to vector<8x128xf32>
      %95 = arith.subf %6, %94 : vector<8x128xf32>
      %96 = math.absf %95 : vector<8x128xf32>
      %cst_36 = arith.constant 0.327591091 : f32
      %97 = vector.broadcast %cst_36 : f32 to vector<8x128xf32>
      %98 = arith.mulf %97, %96 : vector<8x128xf32>
      %cst_37 = arith.constant 1.000000e+00 : f32
      %99 = vector.broadcast %cst_37 : f32 to vector<8x128xf32>
      %100 = arith.addf %99, %98 : vector<8x128xf32>
      %101 = tpu.reciprocal %100 {approx = true} : vector<8x128xf32> -> vector<8x128xf32>
      %cst_38 = arith.constant 1.06140542 : f32
      %102 = vector.broadcast %cst_38 : f32 to vector<8x128xf32>
      %103 = arith.mulf %102, %101 : vector<8x128xf32>
      %cst_39 = arith.constant -1.45315206 : f32
      %104 = vector.broadcast %cst_39 : f32 to vector<8x128xf32>
      %105 = arith.addf %103, %104 : vector<8x128xf32>
      %106 = arith.mulf %105, %101 : vector<8x128xf32>
      %cst_40 = arith.constant 1.42141378 : f32
      %107 = vector.broadcast %cst_40 : f32 to vector<8x128xf32>
      %108 = arith.addf %106, %107 : vector<8x128xf32>
      %109 = arith.mulf %108, %101 : vector<8x128xf32>
      %cst_41 = arith.constant -0.284496725 : f32
      %110 = vector.broadcast %cst_41 : f32 to vector<8x128xf32>
      %111 = arith.addf %109, %110 : vector<8x128xf32>
      %112 = arith.mulf %111, %101 : vector<8x128xf32>
      %cst_42 = arith.constant 0.254829586 : f32
      %113 = vector.broadcast %cst_42 : f32 to vector<8x128xf32>
      %114 = arith.addf %112, %113 : vector<8x128xf32>
      %115 = arith.mulf %114, %101 : vector<8x128xf32>
      %cst_43 = arith.constant 0.000000e+00 : f32
      %116 = vector.broadcast %cst_43 : f32 to vector<8x128xf32>
      %117 = arith.subf %116, %96 : vector<8x128xf32>
      %118 = arith.mulf %117, %96 : vector<8x128xf32>
      %119 = math.exp %118 : vector<8x128xf32>
      %120 = arith.mulf %115, %119 : vector<8x128xf32>
      %cst_44 = arith.constant 1.000000e+00 : f32
      %121 = vector.broadcast %cst_44 : f32 to vector<8x128xf32>
      %122 = arith.subf %121, %120 : vector<8x128xf32>
      %cst_45 = arith.constant 0.000000e+00 : f32
      %123 = vector.broadcast %cst_45 : f32 to vector<8x128xf32>
      %124 = arith.cmpf olt, %95, %123 : vector<8x128xf32>
      %cst_46 = arith.constant 0.000000e+00 : f32
      %125 = vector.broadcast %cst_46 : f32 to vector<8x128xf32>
      %126 = arith.subf %125, %122 : vector<8x128xf32>
      %127 = arith.select %124, %126, %122 : vector<8x128xi1>, vector<8x128xf32>
      %128 = arith.addf %92, %127 : vector<8x128xf32>
      %129 = vector.extract_strided_slice %20 {offsets = [3, 0], sizes = [1, 128], strides = [1, 1]} : vector<8x128xf32> to vector<1x128xf32>
      %130 = vector.broadcast %129 : vector<1x128xf32> to vector<8x128xf32>
      %131 = arith.subf %6, %130 : vector<8x128xf32>
      %132 = math.absf %131 : vector<8x128xf32>
      %cst_47 = arith.constant 0.327591091 : f32
      %133 = vector.broadcast %cst_47 : f32 to vector<8x128xf32>
      %134 = arith.mulf %133, %132 : vector<8x128xf32>
      %cst_48 = arith.constant 1.000000e+00 : f32
      %135 = vector.broadcast %cst_48 : f32 to vector<8x128xf32>
      %136 = arith.addf %135, %134 : vector<8x128xf32>
      %137 = tpu.reciprocal %136 {approx = true} : vector<8x128xf32> -> vector<8x128xf32>
      %cst_49 = arith.constant 1.06140542 : f32
      %138 = vector.broadcast %cst_49 : f32 to vector<8x128xf32>
      %139 = arith.mulf %138, %137 : vector<8x128xf32>
      %cst_50 = arith.constant -1.45315206 : f32
      %140 = vector.broadcast %cst_50 : f32 to vector<8x128xf32>
      %141 = arith.addf %139, %140 : vector<8x128xf32>
      %142 = arith.mulf %141, %137 : vector<8x128xf32>
      %cst_51 = arith.constant 1.42141378 : f32
      %143 = vector.broadcast %cst_51 : f32 to vector<8x128xf32>
      %144 = arith.addf %142, %143 : vector<8x128xf32>
      %145 = arith.mulf %144, %137 : vector<8x128xf32>
      %cst_52 = arith.constant -0.284496725 : f32
      %146 = vector.broadcast %cst_52 : f32 to vector<8x128xf32>
      %147 = arith.addf %145, %146 : vector<8x128xf32>
      %148 = arith.mulf %147, %137 : vector<8x128xf32>
      %cst_53 = arith.constant 0.254829586 : f32
      %149 = vector.broadcast %cst_53 : f32 to vector<8x128xf32>
      %150 = arith.addf %148, %149 : vector<8x128xf32>
      %151 = arith.mulf %150, %137 : vector<8x128xf32>
      %cst_54 = arith.constant 0.000000e+00 : f32
      %152 = vector.broadcast %cst_54 : f32 to vector<8x128xf32>
      %153 = arith.subf %152, %132 : vector<8x128xf32>
      %154 = arith.mulf %153, %132 : vector<8x128xf32>
      %155 = math.exp %154 : vector<8x128xf32>
      %156 = arith.mulf %151, %155 : vector<8x128xf32>
      %cst_55 = arith.constant 1.000000e+00 : f32
      %157 = vector.broadcast %cst_55 : f32 to vector<8x128xf32>
      %158 = arith.subf %157, %156 : vector<8x128xf32>
      %cst_56 = arith.constant 0.000000e+00 : f32
      %159 = vector.broadcast %cst_56 : f32 to vector<8x128xf32>
      %160 = arith.cmpf olt, %131, %159 : vector<8x128xf32>
      %cst_57 = arith.constant 0.000000e+00 : f32
      %161 = vector.broadcast %cst_57 : f32 to vector<8x128xf32>
      %162 = arith.subf %161, %158 : vector<8x128xf32>
      %163 = arith.select %160, %162, %158 : vector<8x128xi1>, vector<8x128xf32>
      %164 = arith.addf %128, %163 : vector<8x128xf32>
      %165 = vector.extract_strided_slice %20 {offsets = [4, 0], sizes = [1, 128], strides = [1, 1]} : vector<8x128xf32> to vector<1x128xf32>
      %166 = vector.broadcast %165 : vector<1x128xf32> to vector<8x128xf32>
      %167 = arith.subf %6, %166 : vector<8x128xf32>
      %168 = math.absf %167 : vector<8x128xf32>
      %cst_58 = arith.constant 0.327591091 : f32
      %169 = vector.broadcast %cst_58 : f32 to vector<8x128xf32>
      %170 = arith.mulf %169, %168 : vector<8x128xf32>
      %cst_59 = arith.constant 1.000000e+00 : f32
      %171 = vector.broadcast %cst_59 : f32 to vector<8x128xf32>
      %172 = arith.addf %171, %170 : vector<8x128xf32>
      %173 = tpu.reciprocal %172 {approx = true} : vector<8x128xf32> -> vector<8x128xf32>
      %cst_60 = arith.constant 1.06140542 : f32
      %174 = vector.broadcast %cst_60 : f32 to vector<8x128xf32>
      %175 = arith.mulf %174, %173 : vector<8x128xf32>
      %cst_61 = arith.constant -1.45315206 : f32
      %176 = vector.broadcast %cst_61 : f32 to vector<8x128xf32>
      %177 = arith.addf %175, %176 : vector<8x128xf32>
      %178 = arith.mulf %177, %173 : vector<8x128xf32>
      %cst_62 = arith.constant 1.42141378 : f32
      %179 = vector.broadcast %cst_62 : f32 to vector<8x128xf32>
      %180 = arith.addf %178, %179 : vector<8x128xf32>
      %181 = arith.mulf %180, %173 : vector<8x128xf32>
      %cst_63 = arith.constant -0.284496725 : f32
      %182 = vector.broadcast %cst_63 : f32 to vector<8x128xf32>
      %183 = arith.addf %181, %182 : vector<8x128xf32>
      %184 = arith.mulf %183, %173 : vector<8x128xf32>
      %cst_64 = arith.constant 0.254829586 : f32
      %185 = vector.broadcast %cst_64 : f32 to vector<8x128xf32>
      %186 = arith.addf %184, %185 : vector<8x128xf32>
      %187 = arith.mulf %186, %173 : vector<8x128xf32>
      %cst_65 = arith.constant 0.000000e+00 : f32
      %188 = vector.broadcast %cst_65 : f32 to vector<8x128xf32>
      %189 = arith.subf %188, %168 : vector<8x128xf32>
      %190 = arith.mulf %189, %168 : vector<8x128xf32>
      %191 = math.exp %190 : vector<8x128xf32>
      %192 = arith.mulf %187, %191 : vector<8x128xf32>
      %cst_66 = arith.constant 1.000000e+00 : f32
      %193 = vector.broadcast %cst_66 : f32 to vector<8x128xf32>
      %194 = arith.subf %193, %192 : vector<8x128xf32>
      %cst_67 = arith.constant 0.000000e+00 : f32
      %195 = vector.broadcast %cst_67 : f32 to vector<8x128xf32>
      %196 = arith.cmpf olt, %167, %195 : vector<8x128xf32>
      %cst_68 = arith.constant 0.000000e+00 : f32
      %197 = vector.broadcast %cst_68 : f32 to vector<8x128xf32>
      %198 = arith.subf %197, %194 : vector<8x128xf32>
      %199 = arith.select %196, %198, %194 : vector<8x128xi1>, vector<8x128xf32>
      %200 = arith.addf %164, %199 : vector<8x128xf32>
      %201 = vector.extract_strided_slice %20 {offsets = [5, 0], sizes = [1, 128], strides = [1, 1]} : vector<8x128xf32> to vector<1x128xf32>
      %202 = vector.broadcast %201 : vector<1x128xf32> to vector<8x128xf32>
      %203 = arith.subf %6, %202 : vector<8x128xf32>
      %204 = math.absf %203 : vector<8x128xf32>
      %cst_69 = arith.constant 0.327591091 : f32
      %205 = vector.broadcast %cst_69 : f32 to vector<8x128xf32>
      %206 = arith.mulf %205, %204 : vector<8x128xf32>
      %cst_70 = arith.constant 1.000000e+00 : f32
      %207 = vector.broadcast %cst_70 : f32 to vector<8x128xf32>
      %208 = arith.addf %207, %206 : vector<8x128xf32>
      %209 = tpu.reciprocal %208 {approx = true} : vector<8x128xf32> -> vector<8x128xf32>
      %cst_71 = arith.constant 1.06140542 : f32
      %210 = vector.broadcast %cst_71 : f32 to vector<8x128xf32>
      %211 = arith.mulf %210, %209 : vector<8x128xf32>
      %cst_72 = arith.constant -1.45315206 : f32
      %212 = vector.broadcast %cst_72 : f32 to vector<8x128xf32>
      %213 = arith.addf %211, %212 : vector<8x128xf32>
      %214 = arith.mulf %213, %209 : vector<8x128xf32>
      %cst_73 = arith.constant 1.42141378 : f32
      %215 = vector.broadcast %cst_73 : f32 to vector<8x128xf32>
      %216 = arith.addf %214, %215 : vector<8x128xf32>
      %217 = arith.mulf %216, %209 : vector<8x128xf32>
      %cst_74 = arith.constant -0.284496725 : f32
      %218 = vector.broadcast %cst_74 : f32 to vector<8x128xf32>
      %219 = arith.addf %217, %218 : vector<8x128xf32>
      %220 = arith.mulf %219, %209 : vector<8x128xf32>
      %cst_75 = arith.constant 0.254829586 : f32
      %221 = vector.broadcast %cst_75 : f32 to vector<8x128xf32>
      %222 = arith.addf %220, %221 : vector<8x128xf32>
      %223 = arith.mulf %222, %209 : vector<8x128xf32>
      %cst_76 = arith.constant 0.000000e+00 : f32
      %224 = vector.broadcast %cst_76 : f32 to vector<8x128xf32>
      %225 = arith.subf %224, %204 : vector<8x128xf32>
      %226 = arith.mulf %225, %204 : vector<8x128xf32>
      %227 = math.exp %226 : vector<8x128xf32>
      %228 = arith.mulf %223, %227 : vector<8x128xf32>
      %cst_77 = arith.constant 1.000000e+00 : f32
      %229 = vector.broadcast %cst_77 : f32 to vector<8x128xf32>
      %230 = arith.subf %229, %228 : vector<8x128xf32>
      %cst_78 = arith.constant 0.000000e+00 : f32
      %231 = vector.broadcast %cst_78 : f32 to vector<8x128xf32>
      %232 = arith.cmpf olt, %203, %231 : vector<8x128xf32>
      %cst_79 = arith.constant 0.000000e+00 : f32
      %233 = vector.broadcast %cst_79 : f32 to vector<8x128xf32>
      %234 = arith.subf %233, %230 : vector<8x128xf32>
      %235 = arith.select %232, %234, %230 : vector<8x128xi1>, vector<8x128xf32>
      %236 = arith.addf %200, %235 : vector<8x128xf32>
      %237 = vector.extract_strided_slice %20 {offsets = [6, 0], sizes = [1, 128], strides = [1, 1]} : vector<8x128xf32> to vector<1x128xf32>
      %238 = vector.broadcast %237 : vector<1x128xf32> to vector<8x128xf32>
      %239 = arith.subf %6, %238 : vector<8x128xf32>
      %240 = math.absf %239 : vector<8x128xf32>
      %cst_80 = arith.constant 0.327591091 : f32
      %241 = vector.broadcast %cst_80 : f32 to vector<8x128xf32>
      %242 = arith.mulf %241, %240 : vector<8x128xf32>
      %cst_81 = arith.constant 1.000000e+00 : f32
      %243 = vector.broadcast %cst_81 : f32 to vector<8x128xf32>
      %244 = arith.addf %243, %242 : vector<8x128xf32>
      %245 = tpu.reciprocal %244 {approx = true} : vector<8x128xf32> -> vector<8x128xf32>
      %cst_82 = arith.constant 1.06140542 : f32
      %246 = vector.broadcast %cst_82 : f32 to vector<8x128xf32>
      %247 = arith.mulf %246, %245 : vector<8x128xf32>
      %cst_83 = arith.constant -1.45315206 : f32
      %248 = vector.broadcast %cst_83 : f32 to vector<8x128xf32>
      %249 = arith.addf %247, %248 : vector<8x128xf32>
      %250 = arith.mulf %249, %245 : vector<8x128xf32>
      %cst_84 = arith.constant 1.42141378 : f32
      %251 = vector.broadcast %cst_84 : f32 to vector<8x128xf32>
      %252 = arith.addf %250, %251 : vector<8x128xf32>
      %253 = arith.mulf %252, %245 : vector<8x128xf32>
      %cst_85 = arith.constant -0.284496725 : f32
      %254 = vector.broadcast %cst_85 : f32 to vector<8x128xf32>
      %255 = arith.addf %253, %254 : vector<8x128xf32>
      %256 = arith.mulf %255, %245 : vector<8x128xf32>
      %cst_86 = arith.constant 0.254829586 : f32
      %257 = vector.broadcast %cst_86 : f32 to vector<8x128xf32>
      %258 = arith.addf %256, %257 : vector<8x128xf32>
      %259 = arith.mulf %258, %245 : vector<8x128xf32>
      %cst_87 = arith.constant 0.000000e+00 : f32
      %260 = vector.broadcast %cst_87 : f32 to vector<8x128xf32>
      %261 = arith.subf %260, %240 : vector<8x128xf32>
      %262 = arith.mulf %261, %240 : vector<8x128xf32>
      %263 = math.exp %262 : vector<8x128xf32>
      %264 = arith.mulf %259, %263 : vector<8x128xf32>
      %cst_88 = arith.constant 1.000000e+00 : f32
      %265 = vector.broadcast %cst_88 : f32 to vector<8x128xf32>
      %266 = arith.subf %265, %264 : vector<8x128xf32>
      %cst_89 = arith.constant 0.000000e+00 : f32
      %267 = vector.broadcast %cst_89 : f32 to vector<8x128xf32>
      %268 = arith.cmpf olt, %239, %267 : vector<8x128xf32>
      %cst_90 = arith.constant 0.000000e+00 : f32
      %269 = vector.broadcast %cst_90 : f32 to vector<8x128xf32>
      %270 = arith.subf %269, %266 : vector<8x128xf32>
      %271 = arith.select %268, %270, %266 : vector<8x128xi1>, vector<8x128xf32>
      %272 = arith.addf %236, %271 : vector<8x128xf32>
      %273 = vector.extract_strided_slice %20 {offsets = [7, 0], sizes = [1, 128], strides = [1, 1]} : vector<8x128xf32> to vector<1x128xf32>
      %274 = vector.broadcast %273 : vector<1x128xf32> to vector<8x128xf32>
      %275 = arith.subf %6, %274 : vector<8x128xf32>
      %276 = math.absf %275 : vector<8x128xf32>
      %cst_91 = arith.constant 0.327591091 : f32
      %277 = vector.broadcast %cst_91 : f32 to vector<8x128xf32>
      %278 = arith.mulf %277, %276 : vector<8x128xf32>
      %cst_92 = arith.constant 1.000000e+00 : f32
      %279 = vector.broadcast %cst_92 : f32 to vector<8x128xf32>
      %280 = arith.addf %279, %278 : vector<8x128xf32>
      %281 = tpu.reciprocal %280 {approx = true} : vector<8x128xf32> -> vector<8x128xf32>
      %cst_93 = arith.constant 1.06140542 : f32
      %282 = vector.broadcast %cst_93 : f32 to vector<8x128xf32>
      %283 = arith.mulf %282, %281 : vector<8x128xf32>
      %cst_94 = arith.constant -1.45315206 : f32
      %284 = vector.broadcast %cst_94 : f32 to vector<8x128xf32>
      %285 = arith.addf %283, %284 : vector<8x128xf32>
      %286 = arith.mulf %285, %281 : vector<8x128xf32>
      %cst_95 = arith.constant 1.42141378 : f32
      %287 = vector.broadcast %cst_95 : f32 to vector<8x128xf32>
      %288 = arith.addf %286, %287 : vector<8x128xf32>
      %289 = arith.mulf %288, %281 : vector<8x128xf32>
      %cst_96 = arith.constant -0.284496725 : f32
      %290 = vector.broadcast %cst_96 : f32 to vector<8x128xf32>
      %291 = arith.addf %289, %290 : vector<8x128xf32>
      %292 = arith.mulf %291, %281 : vector<8x128xf32>
      %cst_97 = arith.constant 0.254829586 : f32
      %293 = vector.broadcast %cst_97 : f32 to vector<8x128xf32>
      %294 = arith.addf %292, %293 : vector<8x128xf32>
      %295 = arith.mulf %294, %281 : vector<8x128xf32>
      %cst_98 = arith.constant 0.000000e+00 : f32
      %296 = vector.broadcast %cst_98 : f32 to vector<8x128xf32>
      %297 = arith.subf %296, %276 : vector<8x128xf32>
      %298 = arith.mulf %297, %276 : vector<8x128xf32>
      %299 = math.exp %298 : vector<8x128xf32>
      %300 = arith.mulf %295, %299 : vector<8x128xf32>
      %cst_99 = arith.constant 1.000000e+00 : f32
      %301 = vector.broadcast %cst_99 : f32 to vector<8x128xf32>
      %302 = arith.subf %301, %300 : vector<8x128xf32>
      %cst_100 = arith.constant 0.000000e+00 : f32
      %303 = vector.broadcast %cst_100 : f32 to vector<8x128xf32>
      %304 = arith.cmpf olt, %275, %303 : vector<8x128xf32>
      %cst_101 = arith.constant 0.000000e+00 : f32
      %305 = vector.broadcast %cst_101 : f32 to vector<8x128xf32>
      %306 = arith.subf %305, %302 : vector<8x128xf32>
      %307 = arith.select %304, %306, %302 : vector<8x128xi1>, vector<8x128xf32>
      %308 = arith.addf %272, %307 : vector<8x128xf32>
      scf.yield %308 : vector<8x128xf32>
    }
    %c8_i32_5 = arith.constant 8 : i32
    %c0_6 = arith.constant 0 : index
    %c0_7 = arith.constant 0 : index
    %10 = vector.load %arg6[%c0_6, %c0_7] : memref<8x128xf32, #tpu.memory_space<vmem>>, vector<8x128xf32>
    %11 = arith.addf %10, %9 : vector<8x128xf32>
    %c0_8 = arith.constant 0 : index
    %c0_9 = arith.constant 0 : index
    %12 = vector.load %arg6[%c0_8, %c0_9] : memref<8x128xf32, #tpu.memory_space<vmem>>, vector<8x128xf32>
    tpu.vector_store %arg6[%c0_8, %c0_9], %11 {strides = array<i32>} : memref<8x128xf32, #tpu.memory_space<vmem>>, vector<8x128xf32>,
    %c0_i32_10 = arith.constant 0 : i32
    %13 = arith.cmpi eq, %arg1, %c0_i32_10 : i32
    %14 = arith.extui %13 : i1 to i32
    %c0_i32_11 = arith.constant 0 : i32
    %15 = arith.cmpi ne, %14, %c0_i32_11 : i32
    scf.if %15 {
      %c0_12 = arith.constant 0 : index
      %c0_13 = arith.constant 0 : index
      %16 = vector.load %arg6[%c0_12, %c0_13] : memref<8x128xf32, #tpu.memory_space<vmem>>, vector<8x128xf32>
      %cst_14 = arith.constant 0.000000e+00 : f32
      %17 = vector.broadcast %cst_14 : f32 to vector<8x128xf32>
      %18 = arith.addf %16, %17 : vector<8x128xf32>
      %cst_15 = arith.constant 7.812500e-03 : f32
      %19 = vector.broadcast %cst_15 : f32 to vector<8x128xf32>
      %20 = arith.mulf %18, %19 : vector<8x128xf32>
      %cst_16 = arith.constant 5.000000e-01 : f32
      %21 = vector.broadcast %cst_16 : f32 to vector<8x128xf32>
      %22 = arith.addf %20, %21 : vector<8x128xf32>
      %cst_17 = arith.constant 9.000000e-08 : f32
      %cst_18 = arith.constant 0.99999988 : f32
      %23 = vector.broadcast %cst_17 : f32 to vector<8x128xf32>
      %24 = arith.maximumf %23, %22 : vector<8x128xf32>
      %25 = vector.broadcast %cst_18 : f32 to vector<8x128xf32>
      %26 = arith.minimumf %25, %24 : vector<8x128xf32>
      %cst_19 = arith.constant 2.000000e+00 : f32
      %27 = vector.broadcast %cst_19 : f32 to vector<8x128xf32>
      %28 = arith.mulf %27, %26 : vector<8x128xf32>
      %cst_20 = arith.constant 1.000000e+00 : f32
      %29 = vector.broadcast %cst_20 : f32 to vector<8x128xf32>
      %30 = arith.subf %28, %29 : vector<8x128xf32>
      %cst_21 = arith.constant 1.000000e+00 : f32
      %31 = vector.broadcast %cst_21 : f32 to vector<8x128xf32>
      %32 = arith.subf %31, %30 : vector<8x128xf32>
      %cst_22 = arith.constant 1.000000e+00 : f32
      %33 = vector.broadcast %cst_22 : f32 to vector<8x128xf32>
      %34 = arith.addf %33, %30 : vector<8x128xf32>
      %35 = arith.mulf %32, %34 : vector<8x128xf32>
      %36 = math.log %35 : vector<8x128xf32>
      %cst_23 = arith.constant 0.000000e+00 : f32
      %37 = vector.broadcast %cst_23 : f32 to vector<8x128xf32>
      %38 = arith.subf %37, %36 : vector<8x128xf32>
      %cst_24 = arith.constant 2.500000e+00 : f32
      %39 = vector.broadcast %cst_24 : f32 to vector<8x128xf32>
      %40 = arith.subf %38, %39 : vector<8x128xf32>
      %cst_25 = arith.constant 2.81022636E-8 : f32
      %41 = vector.broadcast %cst_25 : f32 to vector<8x128xf32>
      %42 = arith.mulf %41, %40 : vector<8x128xf32>
      %cst_26 = arith.constant 3.43273939E-7 : f32
      %43 = vector.broadcast %cst_26 : f32 to vector<8x128xf32>
      %44 = arith.addf %43, %42 : vector<8x128xf32>
      %45 = arith.mulf %44, %40 : vector<8x128xf32>
      %cst_27 = arith.constant -3.5233877E-6 : f32
      %46 = vector.broadcast %cst_27 : f32 to vector<8x128xf32>
      %47 = arith.addf %46, %45 : vector<8x128xf32>
      %48 = arith.mulf %47, %40 : vector<8x128xf32>
      %cst_28 = arith.constant -4.39150654E-6 : f32
      %49 = vector.broadcast %cst_28 : f32 to vector<8x128xf32>
      %50 = arith.addf %49, %48 : vector<8x128xf32>
      %51 = arith.mulf %50, %40 : vector<8x128xf32>
      %cst_29 = arith.constant 2.1858087E-4 : f32
      %52 = vector.broadcast %cst_29 : f32 to vector<8x128xf32>
      %53 = arith.addf %52, %51 : vector<8x128xf32>
      %54 = arith.mulf %53, %40 : vector<8x128xf32>
      %cst_30 = arith.constant -0.00125372503 : f32
      %55 = vector.broadcast %cst_30 : f32 to vector<8x128xf32>
      %56 = arith.addf %55, %54 : vector<8x128xf32>
      %57 = arith.mulf %56, %40 : vector<8x128xf32>
      %cst_31 = arith.constant -0.00417768164 : f32
      %58 = vector.broadcast %cst_31 : f32 to vector<8x128xf32>
      %59 = arith.addf %58, %57 : vector<8x128xf32>
      %60 = arith.mulf %59, %40 : vector<8x128xf32>
      %cst_32 = arith.constant 0.246640727 : f32
      %61 = vector.broadcast %cst_32 : f32 to vector<8x128xf32>
      %62 = arith.addf %61, %60 : vector<8x128xf32>
      %63 = arith.mulf %62, %40 : vector<8x128xf32>
      %cst_33 = arith.constant 1.50140941 : f32
      %64 = vector.broadcast %cst_33 : f32 to vector<8x128xf32>
      %65 = arith.addf %64, %63 : vector<8x128xf32>
      %66 = math.sqrt %38 : vector<8x128xf32>
      %cst_34 = arith.constant 3.000000e+00 : f32
      %67 = vector.broadcast %cst_34 : f32 to vector<8x128xf32>
      %68 = arith.subf %66, %67 : vector<8x128xf32>
      %cst_35 = arith.constant -2.00214257E-4 : f32
      %69 = vector.broadcast %cst_35 : f32 to vector<8x128xf32>
      %70 = arith.mulf %69, %68 : vector<8x128xf32>
      %cst_36 = arith.constant 1.00950558E-4 : f32
      %71 = vector.broadcast %cst_36 : f32 to vector<8x128xf32>
      %72 = arith.addf %71, %70 : vector<8x128xf32>
      %73 = arith.mulf %72, %68 : vector<8x128xf32>
      %cst_37 = arith.constant 0.00134934322 : f32
      %74 = vector.broadcast %cst_37 : f32 to vector<8x128xf32>
      %75 = arith.addf %74, %73 : vector<8x128xf32>
      %76 = arith.mulf %75, %68 : vector<8x128xf32>
      %cst_38 = arith.constant -0.00367342844 : f32
      %77 = vector.broadcast %cst_38 : f32 to vector<8x128xf32>
      %78 = arith.addf %77, %76 : vector<8x128xf32>
      %79 = arith.mulf %78, %68 : vector<8x128xf32>
      %cst_39 = arith.constant 0.00573950773 : f32
      %80 = vector.broadcast %cst_39 : f32 to vector<8x128xf32>
      %81 = arith.addf %80, %79 : vector<8x128xf32>
      %82 = arith.mulf %81, %68 : vector<8x128xf32>
      %cst_40 = arith.constant -0.0076224613 : f32
      %83 = vector.broadcast %cst_40 : f32 to vector<8x128xf32>
      %84 = arith.addf %83, %82 : vector<8x128xf32>
      %85 = arith.mulf %84, %68 : vector<8x128xf32>
      %cst_41 = arith.constant 0.00943887047 : f32
      %86 = vector.broadcast %cst_41 : f32 to vector<8x128xf32>
      %87 = arith.addf %86, %85 : vector<8x128xf32>
      %88 = arith.mulf %87, %68 : vector<8x128xf32>
      %cst_42 = arith.constant 1.00167406 : f32
      %89 = vector.broadcast %cst_42 : f32 to vector<8x128xf32>
      %90 = arith.addf %89, %88 : vector<8x128xf32>
      %91 = arith.mulf %90, %68 : vector<8x128xf32>
      %cst_43 = arith.constant 2.83297682 : f32
      %92 = vector.broadcast %cst_43 : f32 to vector<8x128xf32>
      %93 = arith.addf %92, %91 : vector<8x128xf32>
      %cst_44 = arith.constant 5.000000e+00 : f32
      %94 = vector.broadcast %cst_44 : f32 to vector<8x128xf32>
      %95 = arith.cmpf olt, %38, %94 : vector<8x128xf32>
      %96 = arith.select %95, %65, %93 : vector<8x128xi1>, vector<8x128xf32>
      %97 = arith.mulf %96, %30 : vector<8x128xf32>
      %cst_45 = arith.constant 1.41421354 : f32
      %98 = vector.broadcast %cst_45 : f32 to vector<8x128xf32>
      %99 = arith.mulf %98, %97 : vector<8x128xf32>
      %c0_46 = arith.constant 0 : index
      %c0_47 = arith.constant 0 : index
      %100 = vector.load %arg5[%c0_46, %c0_47] : memref<8x128xf32, #tpu.memory_space<vmem>>, vector<8x128xf32>
      tpu.vector_store %arg5[%c0_46, %c0_47], %99 {strides = array<i32>} : memref<8x128xf32, #tpu.memory_space<vmem>>, vector<8x128xf32>,
    } else {
    }
    return
  }
  func.func @transform_0(%arg0: i32, %arg1: i32) -> (i32, i32) {
    %c0_i32 = arith.constant 0 : i32
    %c0_i32_0 = arith.constant 0 : i32
    return %c0_i32, %arg0 : i32, i32
  }
  func.func @transform_1(%arg0: i32, %arg1: i32) -> (i32, i32, i32) {
    %c0_i32 = arith.constant 0 : i32
    %c0_i32_0 = arith.constant 0 : i32
    return %arg1, %c0_i32, %arg0 : i32, i32, i32
  }
  func.func @transform_2(%arg0: i32, %arg1: i32) -> (i32, i32) {
    %c0_i32 = arith.constant 0 : i32
    %c0_i32_0 = arith.constant 0 : i32
    return %c0_i32, %arg0 : i32, i32
  }
  func.func @transform_3(%arg0: i32, %arg1: i32) -> (i32, i32) {
    %c0_i32 = arith.constant 0 : i32
    %c0_i32_0 = arith.constant 0 : i32
    return %c0_i32, %arg0 : i32, i32
  }
}

</mosaic_0001>

<bundles_post_ra>
// kernel: tpu_custom_call.1
= control target key start
LH: loop header
LB: loop body
LE: loop exit
PB: predicated region body
PF: predicated region fallthrough
CT: control target
= control target key end

     0   :  { %8 = vsyncpa [#allocation4], 0  ;;  %s690_s0 = inlined_call_operand.hbm [shape: f32[8,128], index: 0, kind: input, shape index: {}]   ;;  %s691_s1 = inlined_call_operand.hbm [shape: f32[8,8,128], index: 1, kind: input, shape index: {}]   ;;  %s692_s2 = inlined_call_operand.vmem [shape: f32[1,128], index: 2, kind: input, shape index: {}]   ;;  %s693_s3 = inlined_call_operand.hbm [shape: f32[8,128], index: 3, kind: output, shape index: {}]  }
   0x1   :  { %9 = vsyncpa [#allocation7], 0 }
   0x2   :  { %10 = vsyncpa [#allocation5], 0  ;;  %s527_s12 = smov [#allocation3]   ;;  %s528_s14 = smov [#allocation6]  }
   0x3   :  { %s17_s13 = sshll.u32 %s527_s12, 4  ;;  %s26_s15 = sshll.u32 %s528_s14, 4  ;;  %s18_s13 = int_to_ptr.vmem [resolvable:$true] %s17_s13  ;;  %s27_s15 = int_to_ptr.vmem [resolvable:$true] %s26_s15 }
   0x4   :  { %s453_s16 = scalar_lea.vmem %s18_s13, 128  ;;  %p458_p1 = scmp.lt.s32.totalorder %s18_s13, %s18_s13 }
   0x5   :  { %p454_p0 = scmp.ne.s32.totalorder %s18_s13, %s453_s16  ;;  %p459_p2 = scmp.lt.s32.totalorder %s453_s16, %s453_s16 }
   0x7   :  { %p460_p3 = por %p459_p2, %p458_p1 }
   0x9   :  { %p461_p4 = pnand %p460_p3, %p454_p0 }
   0xb   :  { %464 = shalt.err (!%p461_p4)
}
   0xc   :  { %20 = dma.hbm_to_vmem [thread:$0]  %s690_s0, 128, %s18_s13, [#allocation4]  }
   0xd   :  { %s473_s19 = scalar_lea.vmem %s27_s15, 1024  ;;  %p478_p6 = scmp.lt.s32.totalorder %s27_s15, %s27_s15 }
   0xe   :  { %p474_p5 = scmp.ne.s32.totalorder %s27_s15, %s473_s19  ;;  %p479_p7 = scmp.lt.s32.totalorder %s473_s19, %s473_s19 }
  0x10   :  { %p480_p8 = por %p479_p7, %p478_p6 }
  0x12   :  { %p481_p9 = pnand %p480_p8, %p474_p5 }
  0x14   :  { %484 = shalt.err (!%p481_p9)
}
  0x15   :  { %s529_s20 = smov 128   ;;  %s530_s21 = smov 8  }
  0x16   :  { %32 = dma.hbm_to_vmem [thread:$0]  %s691_s1, 1024, %s27_s15, [#allocation7], %s529_s20, %s529_s20, %s530_s21  }
  0x17   :  { %513 = dma.done.wait [#allocation4], 128  }
  0x18   :  { %514 = vsyncadd [#allocation4], 4294967168 }
  0x19   :  { %515 = dma.done.wait [#allocation7], 1024  }
  0x1a   :  { %516 = vsyncadd [#allocation7], 4294966272  ;;  %v531_v0 = vmov 0.0   ;;  %v562_v1 = vld [vmem:[%s692_s2] ss:$0 sm:$0xff]  ;;  %v47_v2 = vld [vmem:[#allocation3] sm:$0xff] }
  0x1b   :  { %45 = vst [vmem:[#allocation2] sm:$0xff] %v531_v0  ;;  %v565_v3 = vmul.f32 %v562_v1, %v47_v2  ;;  %v567_v4 = vmov 0.0   ;;  %s569_s25 = smov 0  }
  0x1c LB: > { %v66_v5 = vlaneseq  ;;  %s383_s1 = sshll.u32 %s525_s25, 3  ;;  %s60_s25 = sadd.s32 1, %s525_s25   ;;  %s525_s25 = sphi %s569_s25, %s60_s25   ;;  %v521_v4 = vphi %v567_v4, %v694_v4  }
  0x1d   : > { %s63_s2 = scalar_lea.vmem [#allocation6], %s383_s1  ;;  %p57_p10 = scmp.ge.s32.totalorder %s60_s25, 8  }
  0x1e   : > { %v67_v6 = vshrl.u32 %v66_v5, 7  ;;  %v64_v7 = vld [vmem:[%s63_s2] sm:$0xff]  ;;  %s532_s26 = smov (%p57_p10), [#allocation8]  }
  0x1f   : > { %v65_v12 = vmul.f32 %v562_v1, %v64_v7  ;;  %s362_s27 = sshll.u32 (%p57_p10), %s532_s26, 4  ;;  %s363_s27 = int_to_ptr.vmem [resolvable:$true] %s362_s27 }
  0x20   : > { %v68_v8 = vsub.s32 0, %v67_v6  ;;  %v96_v9 = vsub.s32 1, %v67_v6  ;;  %v124_v10 = vsub.s32 2, %v67_v6  ;;  %v152_v11 = vsub.s32 3, %v67_v6  ;;  %s485_s28 = scalar_lea.vmem (%p57_p10), %s363_s27, 128  ;;  %p490_p12 = scmp.lt.s32.totalorder (%p57_p10), %s363_s27, %s363_s27 }
  0x21   : > { %v180_v13 = vsub.s32 4, %v67_v6  ;;  %v208_v14 = vsub.s32 5, %v67_v6  ;;  %v236_v20 = vsub.s32 6, %v67_v6  ;;  %v264_v25 = vsub.s32 7, %v67_v6  ;;  %p486_p11 = scmp.ne.s32.totalorder (%p57_p10), %s363_s27, %s485_s28  ;;  %p491_p13 = scmp.lt.s32.totalorder (%p57_p10), %s485_s28, %s485_s28 }
  0x22   : > { %v69_v15 = vrot.slane %v65_v12, %v68_v8  ;;  %v97_v16 = vrot.slane %v65_v12, %v96_v9  ;;  %v125_v17 = vrot.slane %v65_v12, %v124_v10  ;;  %v153_v18 = vrot.slane %v65_v12, %v152_v11 }
  0x23   : > { %v181_v19 = vrot.slane %v65_v12, %v180_v13  ;;  %v209_v28 = vrot.slane %v65_v12, %v208_v14  ;;  %v237_v31 = vrot.slane %v65_v12, %v236_v20  ;;  %v265_v36 = vrot.slane %v65_v12, %v264_v25  ;;  %p492_p0 = por (%p57_p10), %p491_p13, %p490_p12 }
  0x24   : > { %v580_v21 = vsub.f32 %v565_v3, %v69_v15  ;;  %v583_v22 = vsub.f32 %v565_v3, %v97_v16  ;;  %v586_v23 = vsub.f32 %v565_v3, %v125_v17  ;;  %v589_v24 = vsub.f32 %v565_v3, %v153_v18 }
  0x25   : > { %v596_v34 = vsub.f32 %v565_v3, %v181_v19  ;;  %v599_v40 = vsub.f32 %v565_v3, %v209_v28  ;;  %v602_v41 = vsub.f32 %v565_v3, %v237_v31  ;;  %v607_v47 = vsub.f32 %v565_v3, %v265_v36  ;;  %p493_p1 = pnand (%p57_p10), %p492_p0, %p486_p11 }
  0x26   : > { %v71_v26 = vand.u32 2147483647, %v580_v21  ;;  %v99_v27 = vand.u32 2147483647, %v583_v22  ;;  %v127_v29 = vand.u32 2147483647, %v586_v23 }
  0x27   : > { %v155_v30 = vand.u32 2147483647, %v589_v24  ;;  %v183_v43 = vand.u32 2147483647, %v596_v34  ;;  %v211_v46 = vand.u32 2147483647, %v599_v40 }
  0x28   : > { %v72_v32 = vmul.f32 0.3275911, %v71_v26  ;;  %v100_v33 = vmul.f32 0.3275911, %v99_v27  ;;  %v128_v35 = vmul.f32 0.3275911, %v127_v29 }
  0x29   : > { %v156_v39 = vmul.f32 0.3275911, %v155_v30  ;;  %v184_v45 = vmul.f32 0.3275911, %v183_v43  ;;  %v239_v48 = vand.u32 2147483647, %v602_v41 }
  0x2a   : > { %v73_v37 = vadd.f32 1.0, %v72_v32  ;;  %v101_v38 = vadd.f32 1.0, %v100_v33  ;;  %v129_v42 = vadd.f32 1.0, %v128_v35  ;;  %v84_v49 = vsub.f32 0.0, %v71_v26 }
  0x2b   : > { %v157_v44 = vadd.f32 1.0, %v156_v39  ;;  %v185_v50 = vadd.f32 1.0, %v184_v45  ;;  %v212_v51 = vmul.f32 0.3275911, %v211_v46  ;;  %v112_v52 = vsub.f32 0.0, %v99_v27 }
  0x2c   : > { %409 = vrcp.f32 %v73_v37  ;;  %v240_v53 = vmul.f32 0.3275911, %v239_v48  ;;  %v267_v55 = vand.u32 2147483647, %v607_v47  ;;  %v140_v56 = vsub.f32 0.0, %v127_v29 }
  0x2d   : > { %411 = vrcp.f32 %v101_v38  ;;  %v213_v54 = vadd.f32 1.0, %v212_v51  ;;  %v168_v57 = vsub.f32 0.0, %v155_v30  ;;  %v85_v58 = vmul.f32 %v84_v49, %v71_v26 }
  0x2e   : > { %413 = vrcp.f32 %v129_v42  ;;  %v241_v59 = vadd.f32 1.0, %v240_v53  ;;  %v268_v60 = vmul.f32 0.3275911, %v267_v55  ;;  %v113_v61 = vmul.f32 %v112_v52, %v99_v27 }
  0x2f   : > { %415 = vrcp.f32 %v157_v44  ;;  %v196_v62 = vsub.f32 0.0, %v183_v43  ;;  %v141_v0 = vmul.f32 %v140_v56, %v127_v29  ;;  %v224_v2 = vsub.f32 0.0, %v211_v46 }
  0x30   : > { %417 = vrcp.f32 %v185_v50  ;;  %v269_v63 = vadd.f32 1.0, %v268_v60  ;;  %v86_v5 = vmul.f32 1.442695, %v85_v58  ;;  %v169_v6 = vmul.f32 %v168_v57, %v155_v30 }
  0x31   : > { %419 = vrcp.f32 %v213_v54  ;;  %v114_v8 = vmul.f32 1.442695, %v113_v61  ;;  %v197_v9 = vmul.f32 %v196_v62, %v183_v43  ;;  %v252_v10 = vsub.f32 0.0, %v239_v48 }
  0x32   : > { %421 = vrcp.f32 %v241_v59  ;;  %v142_v14 = vmul.f32 1.442695, %v141_v0  ;;  %v225_v15 = vmul.f32 %v224_v2, %v211_v46  ;;  %v280_v16 = vsub.f32 0.0, %v267_v55 }
  0x33   : > { %423 = vrcp.f32 %v269_v63  ;;  %v170_v18 = vmul.f32 1.442695, %v169_v6  ;;  %v198_v25 = vmul.f32 1.442695, %v197_v9  ;;  %v253_v26 = vmul.f32 %v252_v10, %v239_v48 }
  0x34   : > { %425 = vpow2.f32 %v86_v5  ;;  %v226_v31 = vmul.f32 1.442695, %v225_v15  ;;  %v281_v32 = vmul.f32 %v280_v16, %v267_v55  ;;  %vm90_vm0 = vcmp.lt.f32.partialorder %v580_v21, 0.0 }
  0x35   : > { %427 = vpow2.f32 %v114_v8  ;;  %v254_v39 = vmul.f32 1.442695, %v253_v26  ;;  %vm118_vm1 = vcmp.lt.f32.partialorder %v583_v22, 0.0  ;;  %vm146_vm2 = vcmp.lt.f32.partialorder %v586_v23, 0.0 }
  0x36   : > { %429 = vpow2.f32 %v142_v14  ;;  %v282_v49 = vmul.f32 1.442695, %v281_v32  ;;  %vm174_vm3 = vcmp.lt.f32.partialorder %v589_v24, 0.0  ;;  %vm202_vm4 = vcmp.lt.f32.partialorder %v596_v34, 0.0 }
  0x37   : > { %431 = vpow2.f32 %v170_v18  ;;  %vm230_vm5 = vcmp.lt.f32.partialorder %v599_v40, 0.0  ;;  %vm258_vm6 = vcmp.lt.f32.partialorder %v602_v41, 0.0  ;;  %vm286_vm7 = vcmp.lt.f32.partialorder %v607_v47, 0.0  ;;  %v290_v40 = vld [vmem:[#allocation2] sm:$0xff] (%p57_p10) }
  0x38   : > { %433 = vpow2.f32 %v198_v25 }
  0x39   : > { %v611_v7 = vpop.eup %409  ;;  %435 = vpow2.f32 %v226_v31 }
  0x3a   : > { %v613_v11 = vpop.eup %411  ;;  %v75_v12 = vmul.f32 1.0614054, %v611_v7  ;;  %437 = vpow2.f32 %v254_v39 }
  0x3b   : > { %v103_v13 = vmul.f32 1.0614054, %v613_v11  ;;  %v617_v19 = vpop.eup %413  ;;  %439 = vpow2.f32 %v282_v49 }
  0x3c   : > { %v76_v17 = vadd.f32 -1.4531521, %v75_v12  ;;  %v131_v28 = vmul.f32 1.0614054, %v617_v19  ;;  %v621_v29 = vpop.eup %415 }
  0x3d   : > { %v104_v20 = vadd.f32 -1.4531521, %v103_v13  ;;  %v159_v36 = vmul.f32 1.0614054, %v621_v29  ;;  %v625_v37 = vpop.eup %417 }
  0x3e   : > { %v77_v27 = vmul.f32 %v611_v7, %v76_v17  ;;  %v132_v35 = vadd.f32 -1.4531521, %v131_v28  ;;  %v187_v45 = vmul.f32 1.0614054, %v625_v37  ;;  %v630_v46 = vpop.eup %419 }
  0x3f   : > { %v105_v30 = vmul.f32 %v613_v11, %v104_v20  ;;  %v160_v44 = vadd.f32 -1.4531521, %v159_v36  ;;  %v634_v54 = vpop.eup %421  ;;  %v215_v56 = vmul.f32 1.0614054, %v630_v46 }
  0x40   : > { %v78_v33 = vadd.f32 1.4214138, %v77_v27  ;;  %v133_v43 = vmul.f32 %v617_v19, %v132_v35  ;;  %v188_v53 = vadd.f32 -1.4531521, %v187_v45  ;;  %v640_v61 = vpop.eup %423  ;;  %v243_v0 = vmul.f32 1.0614054, %v634_v54 }
  0x41   : > { %v106_v38 = vadd.f32 1.4214138, %v105_v30  ;;  %v161_v52 = vmul.f32 %v621_v29, %v160_v44  ;;  %v216_v63 = vadd.f32 -1.4531521, %v215_v56  ;;  %v426_v9 = vpop.eup %425  ;;  %v271_v14 = vmul.f32 1.0614054, %v640_v61 }
  0x42   : > { %v79_v42 = vmul.f32 %v611_v7, %v78_v33  ;;  %v134_v51 = vadd.f32 1.4214138, %v133_v43  ;;  %v189_v60 = vmul.f32 %v625_v37, %v188_v53  ;;  %v244_v13 = vadd.f32 -1.4531521, %v243_v0  ;;  %v428_v15 = vpop.eup %427 }
  0x43   : > { %v107_v48 = vmul.f32 %v613_v11, %v106_v38  ;;  %v162_v59 = vadd.f32 1.4214138, %v161_v52  ;;  %v217_v12 = vmul.f32 %v630_v46, %v216_v63  ;;  %v272_v28 = vadd.f32 -1.4531521, %v271_v14  ;;  %v430_v30 = vpop.eup %429 }
  0x44   : > { %v80_v50 = vadd.f32 -0.28449672, %v79_v42  ;;  %v135_v58 = vmul.f32 %v617_v19, %v134_v51  ;;  %v190_v8 = vadd.f32 1.4214138, %v189_v60  ;;  %v245_v27 = vmul.f32 %v634_v54, %v244_v13 }
  0x45   : > { %v108_v55 = vadd.f32 -0.28449672, %v107_v48  ;;  %v163_v6 = vmul.f32 %v621_v29, %v162_v59  ;;  %v218_v26 = vadd.f32 1.4214138, %v217_v12  ;;  %v273_v42 = vmul.f32 %v640_v61, %v272_v28 }
  0x46   : > { %v81_v57 = vmul.f32 %v611_v7, %v80_v50  ;;  %v136_v5 = vadd.f32 -0.28449672, %v135_v58  ;;  %v191_v20 = vmul.f32 %v625_v37, %v190_v8  ;;  %v246_v39 = vadd.f32 1.4214138, %v245_v27 }
  0x47   : > { %v109_v62 = vmul.f32 %v613_v11, %v108_v55  ;;  %v164_v18 = vadd.f32 -0.28449672, %v163_v6  ;;  %v219_v38 = vmul.f32 %v630_v46, %v218_v26  ;;  %v274_v52 = vadd.f32 1.4214138, %v273_v42 }
  0x48   : > { %v82_v2 = vadd.f32 0.2548296, %v81_v57  ;;  %v137_v17 = vmul.f32 %v617_v19, %v136_v5  ;;  %v192_v35 = vadd.f32 -0.28449672, %v191_v20  ;;  %v247_v51 = vmul.f32 %v634_v54, %v246_v39 }
  0x49   : > { %v110_v10 = vadd.f32 0.2548296, %v109_v62  ;;  %v165_v33 = vmul.f32 %v621_v29, %v164_v18  ;;  %v220_v50 = vadd.f32 -0.28449672, %v219_v38 }
  0x4a   : > { %v83_v16 = vmul.f32 %v611_v7, %v82_v2  ;;  %v138_v32 = vadd.f32 0.2548296, %v137_v17  ;;  %v432_v7 = vpop.eup %431  ;;  %v193_v48 = vmul.f32 %v625_v37, %v192_v35  ;;  %v248_v62 = vadd.f32 -0.28449672, %v247_v51 }
  0x4b   : > { %v111_v25 = vmul.f32 %v613_v11, %v110_v10  ;;  %v434_v11 = vpop.eup %433  ;;  %v166_v45 = vadd.f32 0.2548296, %v165_v33  ;;  %v221_v60 = vmul.f32 %v630_v46, %v220_v50 }
  0x4c   : > { %v88_v31 = vmul.f32 %v426_v9, %v83_v16  ;;  %v139_v44 = vmul.f32 %v617_v19, %v138_v32  ;;  %v436_v53 = vpop.eup %435  ;;  %v194_v58 = vadd.f32 0.2548296, %v193_v48  ;;  %v275_v19 = vmul.f32 %v640_v61, %v274_v52 }
  0x4d   : > { %v116_v36 = vmul.f32 %v428_v15, %v111_v25  ;;  %v167_v57 = vmul.f32 %v621_v29, %v166_v45  ;;  %v438_v63 = vpop.eup %437  ;;  %v222_v9 = vadd.f32 0.2548296, %v221_v60  ;;  %v249_v10 = vmul.f32 %v634_v54, %v248_v62 }
  0x4e   : > { %v89_v43 = vsub.f32 1.0, %v88_v31  ;;  %v144_v56 = vmul.f32 %v430_v30, %v139_v44  ;;  %v195_v6 = vmul.f32 %v625_v37, %v194_v58  ;;  %v440_v12 = vpop.eup %439  ;;  %v276_v16 = vadd.f32 -0.28449672, %v275_v19 }
  0x4f   : > { %v117_v49 = vsub.f32 1.0, %v116_v36  ;;  %v172_v5 = vmul.f32 %v432_v7, %v167_v57  ;;  %v223_v21 = vmul.f32 %v630_v46, %v222_v9  ;;  %v250_v18 = vadd.f32 0.2548296, %v249_v10 }
  0x50   : > { %v91_v55 = vsub.f32 0.0, %v89_v43  ;;  %v145_v2 = vsub.f32 1.0, %v144_v56  ;;  %v200_v15 = vmul.f32 %v434_v11, %v195_v6  ;;  %v277_v20 = vmul.f32 %v640_v61, %v276_v16 }
  0x51   : > { %v119_v59 = vsub.f32 0.0, %v117_v49  ;;  %v173_v14 = vsub.f32 1.0, %v172_v5  ;;  %v228_v26 = vmul.f32 %v436_v53, %v223_v21  ;;  %v251_v27 = vmul.f32 %v634_v54, %v250_v18 }
  0x52   : > { %v92_v0 = vsel %vm90_vm0, %v91_v55, %v89_v43  ;;  %v147_v13 = vsub.f32 0.0, %v145_v2  ;;  %v201_v22 = vsub.f32 1.0, %v200_v15  ;;  %v278_v31 = vadd.f32 0.2548296, %v277_v20 }
  0x53   : > { %v93_v8 = vadd.f32 %v521_v4, %v92_v0  ;;  %v120_v29 = vsel %vm118_vm1, %v119_v59, %v117_v49  ;;  %v175_v37 = vsub.f32 0.0, %v173_v14  ;;  %v229_v32 = vsub.f32 1.0, %v228_v26 }
  0x54   : > { %v148_v4 = vsel %vm146_vm2, %v147_v13, %v145_v2  ;;  %v203_v30 = vsub.f32 0.0, %v201_v22  ;;  %v256_v46 = vmul.f32 %v438_v63, %v251_v27  ;;  %v279_v23 = vmul.f32 %v640_v61, %v278_v31 }
  0x55   : > { %v121_v17 = vadd.f32 %v120_v29, %v93_v8  ;;  %v176_v28 = vsel %vm174_vm3, %v175_v37, %v173_v14  ;;  %v231_v7 = vsub.f32 0.0, %v229_v32 }
  0x56   : > { %v204_v33 = vsel %vm202_vm4, %v203_v30, %v201_v22  ;;  %v257_v36 = vsub.f32 1.0, %v256_v46  ;;  %v284_v34 = vmul.f32 %v440_v12, %v279_v23 }
  0x57   : > { %v149_v25 = vadd.f32 %v148_v4, %v121_v17  ;;  %v232_v38 = vsel %vm230_vm5, %v231_v7, %v229_v32 }
  0x58   : > { %v259_v39 = vsub.f32 0.0, %v257_v36  ;;  %v285_v42 = vsub.f32 1.0, %v284_v34 }
  0x59   : > { %v177_v24 = vadd.f32 %v176_v28, %v149_v25 }
  0x5a   : > { %v260_v11 = vsel %vm258_vm6, %v259_v39, %v257_v36  ;;  %v287_v44 = vsub.f32 0.0, %v285_v42 }
  0x5b   : > { %v205_v35 = vadd.f32 %v204_v33, %v177_v24 }
  0x5c   : > { %v288_v45 = vsel %vm286_vm7, %v287_v44, %v285_v42 }
  0x5d   : > { %v233_v54 = vadd.f32 %v232_v38, %v205_v35 }
  0x5f   : > { %v261_v43 = vadd.f32 %v260_v11, %v233_v54  ;;  %59 = sbr.rel (!%p57_p10) target bundleno = 28 (0x1c), region = 56 }
  0x61   : > { %v289_v48 = vadd.f32 %v288_v45, %v261_v43  }
  0x63   : > { %v694_v4 = vmov %v289_v48  ;;  %v291_v41 = vadd.f32 (%p57_p10), %v290_v40, %v289_v48 }
  0x65   :  { %292 = vst [vmem:[#allocation2] sm:$0xff] %v291_v41  ;;  %v298_v61 = vmul.f32 0.0078125, %v291_v41 }
  0x67   :  { %v299_v49 = vadd.f32 0.5, %v298_v61 }
  0x69   :  { %v300_v50 = vmax.f32 %v299_v49, 9e-08 }
  0x6b   :  { %v301_v51 = vmin.f32 %v300_v50, 0.9999999 }
  0x6d   :  { %v302_v47 = vmul.f32 2.0, %v301_v51 }
  0x6f   :  { %v384_v52 = vadd.f32 -1.0, %v302_v47 }
  0x71   :  { %v304_v53 = vsub.f32 1.0, %v384_v52  ;;  %v305_v55 = vadd.f32 1.0, %v384_v52 }
  0x73   :  { %v306_v56 = vmul.f32 %v305_v55, %v304_v53 }
  0x75   :  { %441 = vlog2.f32 %v306_v56 }
  0x82   :  { %v442_v57 = vpop.eup %441 }
  0x83   :  { %v308_v58 = vmul.f32 0.6931472, %v442_v57 }
  0x85   :  { %v309_v59 = vsub.f32 0.0, %v308_v58 }
  0x87   :  { %v385_v60 = vadd.f32 -2.5, %v309_v59  ;;  %443 = vrsqrt.f32 %v309_v59  ;;  %vm329_vm8 = vcmp.eq.f32.partialorder %v309_v59, inf  ;;  %v332_v5 = vand.u32 2147483648, %v309_v59 }
  0x88   :  { %vm331_vm9 = vcmp.eq.f32.partialorder %v309_v59, 0.0  ;;  %vm351_vm10 = vcmp.lt.f32.partialorder %v309_v59, 5.0 }
  0x89   :  { %v311_v62 = vmul.f32 2.8102264e-08, %v385_v60 }
  0x8b   :  { %v312_v19 = vadd.f32 3.4327394e-07, %v311_v62 }
  0x8d   :  { %v313_v1 = vmul.f32 %v385_v60, %v312_v19 }
  0x8f   :  { %v314_v3 = vadd.f32 -3.5233877e-06, %v313_v1 }
  0x91   :  { %v315_v63 = vmul.f32 %v385_v60, %v314_v3 }
  0x93   :  { %v316_v0 = vadd.f32 -4.3915065e-06, %v315_v63 }
  0x94   :  { %v444_v2 = vpop.eup %443 }
  0x95   :  { %v317_v6 = vmul.f32 %v385_v60, %v316_v0  ;;  %v328_v8 = vmul.f32 %v444_v2, %v309_v59 }
  0x97   :  { %v318_v29 = vadd.f32 0.00021858087, %v317_v6  ;;  %v330_v9 = vsel %vm329_vm8, %v309_v59, %v328_v8 }
  0x98   :  { %v333_v10 = vsel %vm331_vm9, %v332_v5, %v330_v9 }
  0x99   :  { %v386_v12 = vadd.f32 -3.0, %v333_v10  ;;  %v319_v13 = vmul.f32 %v385_v60, %v318_v29 }
  0x9b   :  { %v335_v14 = vmul.f32 -0.00020021426, %v386_v12  ;;  %v320_v16 = vadd.f32 -0.001253725, %v319_v13 }
  0x9d   :  { %v336_v15 = vadd.f32 0.00010095056, %v335_v14  ;;  %v321_v18 = vmul.f32 %v385_v60, %v320_v16 }
  0x9f   :  { %v337_v17 = vmul.f32 %v386_v12, %v336_v15  ;;  %v322_v22 = vadd.f32 -0.0041776816, %v321_v18 }
  0xa1   :  { %v338_v21 = vadd.f32 0.0013493432, %v337_v17  ;;  %v323_v26 = vmul.f32 %v385_v60, %v322_v22 }
  0xa3   :  { %v339_v4 = vmul.f32 %v386_v12, %v338_v21  ;;  %v324_v30 = vadd.f32 0.24664073, %v323_v26 }
  0xa5   :  { %v340_v37 = vadd.f32 -0.0036734284, %v339_v4  ;;  %v325_v32 = vmul.f32 %v385_v60, %v324_v30 }
  0xa7   :  { %v341_v20 = vmul.f32 %v386_v12, %v340_v37  ;;  %v326_v23 = vadd.f32 1.5014094, %v325_v32 }
  0xa9   :  { %v342_v25 = vadd.f32 0.0057395077, %v341_v20 }
  0xab   :  { %v343_v27 = vmul.f32 %v386_v12, %v342_v25 }
  0xad   :  { %v344_v28 = vadd.f32 -0.0076224613, %v343_v27 }
  0xaf   :  { %v345_v31 = vmul.f32 %v386_v12, %v344_v28 }
  0xb1   :  { %v346_v24 = vadd.f32 0.0094388705, %v345_v31 }
  0xb3   :  { %v347_v46 = vmul.f32 %v386_v12, %v346_v24 }
  0xb5   :  { %v348_v33 = vadd.f32 1.001674, %v347_v46 }
  0xb7   :  { %v349_v35 = vmul.f32 %v386_v12, %v348_v33 }
  0xb9   :  { %v350_v7 = vadd.f32 2.8329768, %v349_v35 }
  0xbb   :  { %v352_v36 = vsel %vm351_vm10, %v326_v23, %v350_v7 }
  0xbc   :  { %v353_v34 = vmul.f32 %v384_v52, %v352_v36 }
  0xbe   :  { %v354_v38 = vmul.f32 1.4142135, %v353_v34 }
  0xc0   :  { %355 = vst [vmem:[#allocation8] sm:$0xff] %v354_v38 }
  0xc1   :  { %496 = shalt.err (!%p493_p1)
}
  0xc2   :  { %365 = dma.vmem_to_hbm [thread:$0]  %s363_s27, 128, %s693_s3, [#allocation5]  }
  0xc3   :  { %517 = dma.done.wait [#allocation5], 128  }
  0xc4   :  { %518 = vsyncadd [#allocation5], 4294967168 }
  0xc5   :  { %369 = vsyncpa [#allocation4], 1 }
  0xc6   :  { %370 = vsyncpa [#allocation7], 1 }
  0xc7   :  { %371 = vsyncpa [#allocation5], 1 }

</bundles_post_ra>
